<compile_context>
chip_gen: v7x
topology: tpu7x:2x2x1
jax: 0.10.0
libtpu: 0.0.40
codegen_flags: <defaults>
</compile_context>

<pallas_src>
import functools
import math

import jax
import jax.numpy as jnp
from jax import lax
from jax.experimental import pallas as pl
from jax.experimental.pallas import tpu as pltpu


# ------------------------- feature probe: single-buffered residents -------------------------

@functools.lru_cache(maxsize=1)
def _supports_buffered_one():
    """One-time, narrow probe: can this JAX build lower pipeline_mode=pl.Buffered(1)?"""
    if not hasattr(pl, "Buffered"):
        return False

    def _copy(x_ref, o_ref):
        o_ref[...] = x_ref[...]

    try:
        fn = pl.pallas_call(
            _copy,
            out_shape=jax.ShapeDtypeStruct((8, 128), jnp.float32),
            grid=(2,),
            in_specs=[pl.BlockSpec((8, 128), lambda i: (0, 0),
                                   pipeline_mode=pl.Buffered(1))],
            out_specs=pl.BlockSpec((8, 128), lambda i: (0, 0)),
        )
        jax.block_until_ready(fn(jnp.zeros((8, 128), jnp.float32)))
        return True
    except Exception:   # feature probe only -- fall back to default double-buffering
        return False


def _vmem_limit(estimate_bytes, *, floor=16 * 1024 * 1024):
    """Generation-aware scoped-VMEM limit: 2x slack over the tile plan, capped at
    0.7x physical VMEM (128 MiB on v5e/v6e, 64 MiB on v7x)."""
    try:
        physical = pltpu.get_tpu_info().vmem_capacity_bytes
    except Exception:
        physical = 64 * 1024 * 1024        # conservative (v7x) fallback
    cap = int(0.7 * physical)
    return int(min(cap, max(floor, 2 * estimate_bytes)))


# --------------------------- Kernel A: fused QKV projection ---------------------------

def _qkv_proj_kernel(xq_ref, xk_ref, xv_ref, w_ref, b_ref,
                     qo_ref, ko_ref, vo_ref, *, d_model):
    """General case (distinct q/k/v inputs): three matmuls against static column
    slices of the single resident (D, 3D) weight.  Lane-dense (tqp, D) stores."""
    D = d_model
    # NOTE: inputs are cast in-kernel; passing bf16 activations halves input DMA.
    for i, (x_ref, o_ref) in enumerate(((xq_ref, qo_ref),
                                        (xk_ref, ko_ref),
                                        (xv_ref, vo_ref))):
        x = x_ref[...].astype(jnp.bfloat16)                       # (tqp, D)
        w = w_ref[:, i * D:(i + 1) * D]                           # (D, D) bf16
        y = jnp.dot(x, w, preferred_element_type=jnp.float32)
        y = y + b_ref[:, i * D:(i + 1) * D]
        o_ref[...] = y.astype(o_ref.dtype)


def _qkv_proj_fused_kernel(x_ref, w_ref, b_ref, qo_ref, ko_ref, vo_ref, *, d_model):
    """Self-attention fast path (q is k is v): ONE wide-N matmul (tqp,D)@(D,3D)."""
    D = d_model
    x = x_ref[...].astype(jnp.bfloat16)                           # (tqp, D)
    y = jnp.dot(x, w_ref[...], preferred_element_type=jnp.float32) + b_ref[...]
    qo_ref[...] = y[:, 0:D].astype(qo_ref.dtype)
    ko_ref[...] = y[:, D:2 * D].astype(ko_ref.dtype)
    vo_ref[...] = y[:, 2 * D:3 * D].astype(vo_ref.dtype)


# ---------------- Kernel B: flash attention (heads in-kernel) + fused Wo ----------------

def _flash_attn_kernel(q_ref, k_ref, v_ref, wo_ref, bo_ref, o_ref,
                       m_sc, l_sc, acc_sc, *, heads, d_k):
    ki = pl.program_id(2)
    nk = pl.num_programs(2)

    @pl.when(ki == 0)
    def _():                                   # new (batch, q-block) cell
        m_sc[...] = jnp.full_like(m_sc, -jnp.inf)
        l_sc[...] = jnp.zeros_like(l_sc)
        acc_sc[...] = jnp.zeros_like(acc_sc)

    q = q_ref[...]                             # (tq, D) bf16, Wq pre-scaled by 1/sqrt(d_k)
    k = k_ref[...]                             # (tk, D) bf16
    v = v_ref[...]                             # (tk, D) bf16

    for h in range(heads):                     # static unroll; static column slices
        sl = slice(h * d_k, (h + 1) * d_k)
        # s = q_h @ k_h^T, contracting last dims (no materialized transpose), f32 acc.
        s = lax.dot_general(q[:, sl], k[:, sl], (((1,), (1,)), ((), ())),
                            preferred_element_type=jnp.float32)   # (tq, tk)
        m_prev = m_sc[h]                                           # (tq, 1)
        m_new = jnp.maximum(m_prev, jnp.max(s, axis=-1, keepdims=True))
        alpha = jnp.exp(m_prev - m_new)
        # bf16 exponent (EUP bf16 path on v6e/v7x); m/l/acc updates stay f32.
        p = jnp.exp((s - m_new).astype(jnp.bfloat16))              # (tq, tk) bf16
        l_sc[h] = alpha * l_sc[h] + jnp.sum(p.astype(jnp.float32), axis=-1, keepdims=True)
        acc_sc[:, sl] = alpha * acc_sc[:, sl] + jnp.dot(
            p, v[:, sl], preferred_element_type=jnp.float32)
        m_sc[h] = m_new

    @pl.when(ki == nk - 1)
    def _():                                   # all KV blocks done: normalize + fused Wo
        for h in range(heads):
            sl = slice(h * d_k, (h + 1) * d_k)
            acc_sc[:, sl] = acc_sc[:, sl] * pl.reciprocal(l_sc[h], approx=False)
        out = jnp.dot(acc_sc[...].astype(jnp.bfloat16), wo_ref[...],
                      preferred_element_type=jnp.float32)          # (tq, D)
        o_ref[...] = (out + bo_ref[...]).astype(o_ref.dtype)       # lane-dense store


# ----------------------------------- host-side wrapper -----------------------------------

def prepare_params(params, heads):
    """One-time host-side prep: transpose to (in, out), fold 1/sqrt(d_k) into the Q
    columns, concatenate Wq|Wk|Wv into one (D, 3D) weight, cast to bf16."""
    D = params['wq'].shape[0]
    assert D % heads == 0, "d_model must be divisible by heads"
    d_k = D // heads
    scale = 1.0 / math.sqrt(d_k)
    w_qkv = jnp.concatenate(
        [params['wq'].T * scale, params['wk'].T, params['wv'].T],
        axis=1).astype(jnp.bfloat16)                                 # (D, 3D)
    b_qkv = jnp.concatenate(
        [params['bq'] * scale, params['bk'], params['bv']]
    ).reshape(1, 3 * D).astype(jnp.float32)                          # (1, 3D)
    return {
        'w_qkv': w_qkv,
        'b_qkv': b_qkv,
        'wo_t': params['wo'].T.astype(jnp.bfloat16),                 # (D, D)
        'bo': params['bo'].reshape(1, D).astype(jnp.float32),
    }


def multi_head_attention(q, k, v, prepared, *, heads,
                         q_block=256, kv_block=256, proj_block=256):
    """q, k, v: (B, S, D).  `prepared` comes from prepare_params().
    For long sequences on v6e/v7x, q_block/kv_block of 512 further reduce
    K/V re-streaming and grid-step overhead; v5e should stay at 128-256."""
    B, S, D = q.shape
    assert D % heads == 0
    d_k = D // heads

    tqp = min(proj_block, S)
    tq = min(q_block, S)
    tk = min(kv_block, S)
    # v7x has 2 TensorCores fed only by the "parallel" axes (B, S//tq): if B is tiny,
    # halve tq once so at least 2 parallel cells exist.
    if B * (S // tq) < 2 and tq % 2 == 0 and tq >= 16:
        tq //= 2
    assert S % tqp == 0 and S % tq == 0 and S % tk == 0, \
        "seq_len must be divisible by the chosen block sizes"
    # TODO(synk): ragged seq_len (masked tail blocks) not handled.

    use_b1 = _supports_buffered_one()

    def resident(shape, index_map):
        # Constant-index weight/bias blocks: single-buffer them when supported.
        if use_b1:
            return pl.BlockSpec(shape, index_map, pipeline_mode=pl.Buffered(1))
        return pl.BlockSpec(shape, index_map)

    in_itemsize = q.dtype.itemsize
    fused_qkv = (q is k) and (k is v)          # self-attention: one wide-N matmul

    # ---------------- Kernel A: projections -> three lane-dense (B, S, D) bf16 ----------------
    act_in = pl.BlockSpec((pl.Squeezed(), tqp, D), lambda b, i: (b, i, 0))
    act_out = pl.BlockSpec((pl.Squeezed(), tqp, D), lambda b, i: (b, i, 0))
    w_spec = resident((D, 3 * D), lambda b, i: (0, 0))
    b_spec = resident((1, 3 * D), lambda b, i: (0, 0))
    proj_out_shape = jax.ShapeDtypeStruct((B, S, D), jnp.bfloat16)

    n_act_in = 1 if fused_qkv else 3
    proj_vmem = ((1 if use_b1 else 2) * (3 * D * D * 2 + 3 * D * 4)   # resident W/b
                 + n_act_in * 2 * tqp * D * in_itemsize               # input tiles
                 + 3 * 2 * tqp * D * 2)                               # output tiles
    # TODO(synk): for d_model >~ 2048 add a K-reduction / output-N grid axis so the
    #             (D, 3D) weight need not be fully VMEM-resident (binding on v7x).

    if fused_qkv:
        kernel_a = functools.partial(_qkv_proj_fused_kernel, d_model=D)
        a_in_specs = [act_in, w_spec, b_spec]
        a_args = (q, prepared['w_qkv'], prepared['b_qkv'])
    else:
        kernel_a = functools.partial(_qkv_proj_kernel, d_model=D)
        a_in_specs = [act_in, act_in, act_in, w_spec, b_spec]
        a_args = (q, k, v, prepared['w_qkv'], prepared['b_qkv'])

    qh, kh, vh = pl.pallas_call(
        kernel_a,
        out_shape=(proj_out_shape, proj_out_shape, proj_out_shape),
        grid_spec=pltpu.PrefetchScalarGridSpec(
            num_scalar_prefetch=0,
            grid=(B, S // tqp),
            in_specs=a_in_specs,
            out_specs=[act_out, act_out, act_out],
        ),
        compiler_params=pltpu.CompilerParams(
            dimension_semantics=("parallel", "parallel"),
            vmem_limit_bytes=_vmem_limit(proj_vmem)),
    )(*a_args)

    # ---------- Kernel B: flash attention (heads in-kernel) + fused output projection ----------
    q_spec = pl.BlockSpec((pl.Squeezed(), tq, D), lambda b, qi, ki: (b, qi, 0))
    kv_spec = pl.BlockSpec((pl.Squeezed(), tk, D), lambda b, qi, ki: (b, ki, 0))
    wo_spec = resident((D, D), lambda b, qi, ki: (0, 0))
    bo_spec = resident((1, D), lambda b, qi, ki: (0, 0))
    out_spec = pl.BlockSpec((pl.Squeezed(), tq, D), lambda b, qi, ki: (b, qi, 0))

    attn_vmem = (2 * tq * D * 2                              # Q tiles (double-buffered, bf16)
                 + 2 * 2 * tk * D * 2                        # K, V tiles
                 + (1 if use_b1 else 2) * (D * D * 2 + D * 4)  # resident Wo + bias
                 + 2 * tq * D * q.dtype.itemsize             # output tiles
                 + 2 * heads * tq * 128 * 4                  # m, l scratch (lane-padded)
                 + tq * D * 4)                               # concat-context accumulator

    return pl.pallas_call(
        functools.partial(_flash_attn_kernel, heads=heads, d_k=d_k),
        out_shape=jax.ShapeDtypeStruct((B, S, D), q.dtype),
        grid_spec=pltpu.PrefetchScalarGridSpec(
            num_scalar_prefetch=0,
            grid=(B, S // tq, S // tk),
            in_specs=[q_spec, kv_spec, kv_spec, wo_spec, bo_spec],
            out_specs=out_spec,
            scratch_shapes=[
                pltpu.VMEM((heads, tq, 1), jnp.float32),     # running max, per head
                pltpu.VMEM((heads, tq, 1), jnp.float32),     # running sum, per head
                pltpu.VMEM((tq, D), jnp.float32),            # concat-context accumulator
            ]),
        compiler_params=pltpu.CompilerParams(
            dimension_semantics=("parallel", "parallel", "arbitrary"),
            vmem_limit_bytes=_vmem_limit(attn_vmem)),
    )(qh, kh, vh, prepared['wo_t'], prepared['bo'])


def _reference(q, k, v, params, *, heads):
    """Pure-JAX f32 reference mirroring the PyTorch forward (eval mode, mask=None)."""
    B, S, D = q.shape
    d_k = D // heads

    def lin(x, w, b):
        return x @ w.T + b

    kp = lin(k, params['wk'], params['bk']).reshape(B, S, heads, d_k).transpose(0, 2, 1, 3)
    qp = lin(q, params['wq'], params['bq']).reshape(B, S, heads, d_k).transpose(0, 2, 1, 3)
    vp = lin(v, params['wv'], params['bv']).reshape(B, S, heads, d_k).transpose(0, 2, 1, 3)

    scores = jnp.einsum('bhqd,bhkd->bhqk', qp, kp) / math.sqrt(d_k)
    probs = jax.nn.softmax(scores, axis=-1)
    ctx = jnp.einsum('bhqk,bhkd->bhqd', probs, vp)
    concat = ctx.transpose(0, 2, 1, 3).reshape(B, S, D)
    return lin(concat, params['wo'], params['bo'])


if __name__ == "__main__":
    B, S, D, H = 2, 8, 32, 4

    key = jax.random.PRNGKey(0)
    keys = jax.random.split(key, 12)

    # Deterministic parameter init (PyTorch nn.Linear shapes: weight (D, D), bias (D,))
    bound = 1.0 / math.sqrt(D)
    params = {
        'wq': jax.random.uniform(keys[0], (D, D), jnp.float32, -bound, bound),
        'bq': jax.random.uniform(keys[1], (D,), jnp.float32, -bound, bound),
        'wk': jax.random.uniform(keys[2], (D, D), jnp.float32, -bound, bound),
        'bk': jax.random.uniform(keys[3], (D,), jnp.float32, -bound, bound),
        'wv': jax.random.uniform(keys[4], (D, D), jnp.float32, -bound, bound),
        'bv': jax.random.uniform(keys[5], (D,), jnp.float32, -bound, bound),
        'wo': jax.random.uniform(keys[6], (D, D), jnp.float32, -bound, bound),
        'bo': jax.random.uniform(keys[7], (D,), jnp.float32, -bound, bound),
    }

    q = jax.random.normal(keys[8], (B, S, D), jnp.float32)
    k = jax.random.normal(keys[9], (B, S, D), jnp.float32)
    v = jax.random.normal(keys[10], (B, S, D), jnp.float32)

    prepared = prepare_params(params, H)          # one-time host-side weight prep

    # General (cross-attention) path: distinct q, k, v.
    out = multi_head_attention(q, k, v, prepared, heads=H)
    out = jax.block_until_ready(out)
    ref = _reference(q, k, v, params, heads=H)
    assert out.shape == (B, S, D)
    # bf16 MXU operands / bf16 exp argument with f32 accumulation -> loosened tolerance.
    assert jnp.allclose(out, ref, atol=5e-2, rtol=5e-2), "mismatch vs reference (cross)"

    # Self-attention fast path: single fused (tqp, D) @ (D, 3D) projection matmul.
    out_self = multi_head_attention(q, q, q, prepared, heads=H)
    out_self = jax.block_until_ready(out_self)
    ref_self = _reference(q, q, q, params, heads=H)
    assert jnp.allclose(out_self, ref_self, atol=5e-2, rtol=5e-2), "mismatch vs reference (self)"

    print("KERNEL_OK")
</pallas_src>

<mosaic_0001>
module attributes {stable_mosaic.version = 11 : i64} {
  func.func @_copy(%arg0: i32, %arg1: memref<8x128xf32, #tpu.memory_space<vmem>>, %arg2: memref<8x128xf32, #tpu.memory_space<vmem>>) attributes {dimension_semantics = [#tpu.dimension_semantics<arbitrary>], iteration_bounds = array<i64: 2>, scalar_prefetch = 0 : i64, scratch_operands = 0 : i64, tpu.core_type = #tpu.core_type<tc>, window_params = [{pipeline_mode = #tpu.pipeline_mode<synchronous>, transform_indices = @transform_0, window_bounds = array<i64: 8, 128>}, {pipeline_mode = #tpu.pipeline_mode<synchronous>, transform_indices = @transform_1, window_bounds = array<i64: 8, 128>}]} {
    %c0 = arith.constant 0 : index
    %c0_0 = arith.constant 0 : index
    %0 = vector.load %arg1[%c0, %c0_0] : memref<8x128xf32, #tpu.memory_space<vmem>>, vector<8x128xf32>
    %c0_1 = arith.constant 0 : index
    %c0_2 = arith.constant 0 : index
    %1 = vector.load %arg2[%c0_1, %c0_2] : memref<8x128xf32, #tpu.memory_space<vmem>>, vector<8x128xf32>
    tpu.vector_store %arg2[%c0_1, %c0_2], %0 {strides = array<i32>} : memref<8x128xf32, #tpu.memory_space<vmem>>, vector<8x128xf32>,
    return
  }
  func.func @transform_0(%arg0: i32) -> (i32, i32) {
    %c0_i32 = arith.constant 0 : i32
    %c0_i32_0 = arith.constant 0 : i32
    %c0_i32_1 = arith.constant 0 : i32
    return %c0_i32, %c0_i32_0 : i32, i32
  }
  func.func @transform_1(%arg0: i32) -> (i32, i32) {
    %c0_i32 = arith.constant 0 : i32
    %c0_i32_0 = arith.constant 0 : i32
    %c0_i32_1 = arith.constant 0 : i32
    return %c0_i32, %c0_i32_0 : i32, i32
  }
}

module attributes {stable_mosaic.version = 11 : i64} {
  func.func @_qkv_proj_kernel(%arg0: i32, %arg1: i32, %arg2: memref<1x8x32xf32, #tpu.memory_space<vmem>>, %arg3: memref<1x8x32xf32, #tpu.memory_space<vmem>>, %arg4: memref<1x8x32xf32, #tpu.memory_space<vmem>>, %arg5: memref<32x96xbf16, #tpu.memory_space<vmem>>, %arg6: memref<1x96xf32, #tpu.memory_space<vmem>>, %arg7: memref<1x8x32xbf16, #tpu.memory_space<vmem>>, %arg8: memref<1x8x32xbf16, #tpu.memory_space<vmem>>, %arg9: memref<1x8x32xbf16, #tpu.memory_space<vmem>>) attributes {dimension_semantics = [#tpu.dimension_semantics<parallel>, #tpu.dimension_semantics<parallel>], iteration_bounds = array<i64: 2, 1>, scalar_prefetch = 0 : i64, scratch_operands = 0 : i64, tpu.core_type = #tpu.core_type<tc>, window_params = [{transform_indices = @transform_0, window_bounds = array<i64: 1, 8, 32>}, {transform_indices = @transform_1, window_bounds = array<i64: 1, 8, 32>}, {transform_indices = @transform_2, window_bounds = array<i64: 1, 8, 32>}, {pipeline_mode = #tpu.pipeline_mode<synchronous>, transform_indices = @transform_3, window_bounds = array<i64: 32, 96>}, {pipeline_mode = #tpu.pipeline_mode<synchronous>, transform_indices = @transform_4, window_bounds = array<i64: 1, 96>}, {transform_indices = @transform_5, window_bounds = array<i64: 1, 8, 32>}, {transform_indices = @transform_6, window_bounds = array<i64: 1, 8, 32>}, {transform_indices = @transform_7, window_bounds = array<i64: 1, 8, 32>}]} {
    %c0 = arith.constant 0 : index
    %c0_0 = arith.constant 0 : index
    %c0_1 = arith.constant 0 : index
    %0 = vector.load %arg2[%c0, %c0_0, %c0_1] : memref<1x8x32xf32, #tpu.memory_space<vmem>>, vector<1x8x32xf32>
    %1 = vector.shape_cast %0 : vector<1x8x32xf32> to vector<8x32xf32>
    %2 = arith.truncf %1 : vector<8x32xf32> to vector<8x32xbf16>
    %c0_2 = arith.constant 0 : index
    %c0_3 = arith.constant 0 : index
    %3 = vector.load %arg5[%c0_2, %c0_3] : memref<32x96xbf16, #tpu.memory_space<vmem>>, vector<32x32xbf16>
    %cst = arith.constant dense<0.000000e+00> : vector<8x32xf32>
    %4 = tpu.matmul %2, %3, %cst {dimension_numbers = #tpu.dot_dimension_numbers<[1], [0], [0], [1], [0, 0, 1, 1], [], []>} : vector<8x32xbf16>, vector<32x32xbf16>, vector<8x32xf32> -> vector<8x32xf32>
    %c0_4 = arith.constant 0 : index
    %c0_5 = arith.constant 0 : index
    %5 = vector.load %arg6[%c0_4, %c0_5] : memref<1x96xf32, #tpu.memory_space<vmem>>, vector<1x32xf32>
    %6 = vector.broadcast %5 : vector<1x32xf32> to vector<8x32xf32>
    %7 = arith.addf %4, %6 : vector<8x32xf32>
    %8 = arith.truncf %7 : vector<8x32xf32> to vector<8x32xbf16>
    %c0_6 = arith.constant 0 : index
    %c0_7 = arith.constant 0 : index
    %c0_8 = arith.constant 0 : index
    %9 = vector.load %arg7[%c0_6, %c0_7, %c0_8] : memref<1x8x32xbf16, #tpu.memory_space<vmem>>, vector<1x8x32xbf16>
    %10 = vector.shape_cast %9 : vector<1x8x32xbf16> to vector<8x32xbf16>
    %11 = vector.shape_cast %8 : vector<8x32xbf16> to vector<1x8x32xbf16>
    tpu.vector_store %arg7[%c0_6, %c0_7, %c0_8], %11 {strides = array<i32>} : memref<1x8x32xbf16, #tpu.memory_space<vmem>>, vector<1x8x32xbf16>,
    %c0_9 = arith.constant 0 : index
    %c0_10 = arith.constant 0 : index
    %c0_11 = arith.constant 0 : index
    %12 = vector.load %arg3[%c0_9, %c0_10, %c0_11] : memref<1x8x32xf32, #tpu.memory_space<vmem>>, vector<1x8x32xf32>
    %13 = vector.shape_cast %12 : vector<1x8x32xf32> to vector<8x32xf32>
    %14 = arith.truncf %13 : vector<8x32xf32> to vector<8x32xbf16>
    %c0_12 = arith.constant 0 : index
    %c32 = arith.constant 32 : index
    %15 = vector.load %arg5[%c0_12, %c32] : memref<32x96xbf16, #tpu.memory_space<vmem>>, vector<32x32xbf16>
    %cst_13 = arith.constant dense<0.000000e+00> : vector<8x32xf32>
    %16 = tpu.matmul %14, %15, %cst_13 {dimension_numbers = #tpu.dot_dimension_numbers<[1], [0], [0], [1], [0, 0, 1, 1], [], []>} : vector<8x32xbf16>, vector<32x32xbf16>, vector<8x32xf32> -> vector<8x32xf32>
    %c0_14 = arith.constant 0 : index
    %c32_15 = arith.constant 32 : index
    %17 = vector.load %arg6[%c0_14, %c32_15] : memref<1x96xf32, #tpu.memory_space<vmem>>, vector<1x32xf32>
    %18 = vector.broadcast %17 : vector<1x32xf32> to vector<8x32xf32>
    %19 = arith.addf %16, %18 : vector<8x32xf32>
    %20 = arith.truncf %19 : vector<8x32xf32> to vector<8x32xbf16>
    %c0_16 = arith.constant 0 : index
    %c0_17 = arith.constant 0 : index
    %c0_18 = arith.constant 0 : index
    %21 = vector.load %arg8[%c0_16, %c0_17, %c0_18] : memref<1x8x32xbf16, #tpu.memory_space<vmem>>, vector<1x8x32xbf16>
    %22 = vector.shape_cast %21 : vector<1x8x32xbf16> to vector<8x32xbf16>
    %23 = vector.shape_cast %20 : vector<8x32xbf16> to vector<1x8x32xbf16>
    tpu.vector_store %arg8[%c0_16, %c0_17, %c0_18], %23 {strides = array<i32>} : memref<1x8x32xbf16, #tpu.memory_space<vmem>>, vector<1x8x32xbf16>,
    %c0_19 = arith.constant 0 : index
    %c0_20 = arith.constant 0 : index
    %c0_21 = arith.constant 0 : index
    %24 = vector.load %arg4[%c0_19, %c0_20, %c0_21] : memref<1x8x32xf32, #tpu.memory_space<vmem>>, vector<1x8x32xf32>
    %25 = vector.shape_cast %24 : vector<1x8x32xf32> to vector<8x32xf32>
    %26 = arith.truncf %25 : vector<8x32xf32> to vector<8x32xbf16>
    %c0_22 = arith.constant 0 : index
    %c64 = arith.constant 64 : index
    %27 = vector.load %arg5[%c0_22, %c64] : memref<32x96xbf16, #tpu.memory_space<vmem>>, vector<32x32xbf16>
    %cst_23 = arith.constant dense<0.000000e+00> : vector<8x32xf32>
    %28 = tpu.matmul %26, %27, %cst_23 {dimension_numbers = #tpu.dot_dimension_numbers<[1], [0], [0], [1], [0, 0, 1, 1], [], []>} : vector<8x32xbf16>, vector<32x32xbf16>, vector<8x32xf32> -> vector<8x32xf32>
    %c0_24 = arith.constant 0 : index
    %c64_25 = arith.constant 64 : index
    %29 = vector.load %arg6[%c0_24, %c64_25] : memref<1x96xf32, #tpu.memory_space<vmem>>, vector<1x32xf32>
    %30 = vector.broadcast %29 : vector<1x32xf32> to vector<8x32xf32>
    %31 = arith.addf %28, %30 : vector<8x32xf32>
    %32 = arith.truncf %31 : vector<8x32xf32> to vector<8x32xbf16>
    %c0_26 = arith.constant 0 : index
    %c0_27 = arith.constant 0 : index
    %c0_28 = arith.constant 0 : index
    %33 = vector.load %arg9[%c0_26, %c0_27, %c0_28] : memref<1x8x32xbf16, #tpu.memory_space<vmem>>, vector<1x8x32xbf16>
    %34 = vector.shape_cast %33 : vector<1x8x32xbf16> to vector<8x32xbf16>
    %35 = vector.shape_cast %32 : vector<8x32xbf16> to vector<1x8x32xbf16>
    tpu.vector_store %arg9[%c0_26, %c0_27, %c0_28], %35 {strides = array<i32>} : memref<1x8x32xbf16, #tpu.memory_space<vmem>>, vector<1x8x32xbf16>,
    return
  }
  func.func @transform_0(%arg0: i32, %arg1: i32) -> (i32, i32, i32) {
    %c0_i32 = arith.constant 0 : i32
    %c0_i32_0 = arith.constant 0 : i32
    return %arg0, %arg1, %c0_i32 : i32, i32, i32
  }
  func.func @transform_1(%arg0: i32, %arg1: i32) -> (i32, i32, i32) {
    %c0_i32 = arith.constant 0 : i32
    %c0_i32_0 = arith.constant 0 : i32
    return %arg0, %arg1, %c0_i32 : i32, i32, i32
  }
  func.func @transform_2(%arg0: i32, %arg1: i32) -> (i32, i32, i32) {
    %c0_i32 = arith.constant 0 : i32
    %c0_i32_0 = arith.constant 0 : i32
    return %arg0, %arg1, %c0_i32 : i32, i32, i32
  }
  func.func @transform_3(%arg0: i32, %arg1: i32) -> (i32, i32) {
    %c0_i32 = arith.constant 0 : i32
    %c0_i32_0 = arith.constant 0 : i32
    %c0_i32_1 = arith.constant 0 : i32
    return %c0_i32, %c0_i32_0 : i32, i32
  }
  func.func @transform_4(%arg0: i32, %arg1: i32) -> (i32, i32) {
    %c0_i32 = arith.constant 0 : i32
    %c0_i32_0 = arith.constant 0 : i32
    %c0_i32_1 = arith.constant 0 : i32
    return %c0_i32, %c0_i32_0 : i32, i32
  }
  func.func @transform_5(%arg0: i32, %arg1: i32) -> (i32, i32, i32) {
    %c0_i32 = arith.constant 0 : i32
    %c0_i32_0 = arith.constant 0 : i32
    return %arg0, %arg1, %c0_i32 : i32, i32, i32
  }
  func.func @transform_6(%arg0: i32, %arg1: i32) -> (i32, i32, i32) {
    %c0_i32 = arith.constant 0 : i32
    %c0_i32_0 = arith.constant 0 : i32
    return %arg0, %arg1, %c0_i32 : i32, i32, i32
  }
  func.func @transform_7(%arg0: i32, %arg1: i32) -> (i32, i32, i32) {
    %c0_i32 = arith.constant 0 : i32
    %c0_i32_0 = arith.constant 0 : i32
    return %arg0, %arg1, %c0_i32 : i32, i32, i32
  }
}

</mosaic_0001>

<bundles_post_ra>
// kernel: tpu_custom_call.1
= control target key start
LH: loop header
LB: loop body
LE: loop exit
PB: predicated region body
PF: predicated region fallthrough
CT: control target
= control target key end

     0   :  { %6 = vsyncpa [#allocation3], 0  ;;  %s340_s0 = inlined_call_operand.hbm [shape: f32[8,128], index: 0, kind: input, shape index: {}]   ;;  %s341_s1 = inlined_call_operand.hbm [shape: f32[8,128], index: 1, kind: output, shape index: {}]  }
   0x1   :  { %7 = vsyncpa [#allocation4], 0  ;;  %s261_s6 = smov 0  }
   0x2 LB: > { %s144_s7 = sadd.s32 4294967295, %s247_s6   ;;  %p145_p0 = scmp.ge.s32.totalorder %s247_s6, 1  ;;  %s247_s6 = sphi %s261_s6, %s13_s6  }
   0x3   : > { %p60_p1 = scmp.lt.s32.totalorder %s247_s6, 3  ;;  %p275_p3 = scmp.eq.s32.totalorder %s144_s7, 0 }
   0x4   : > { %s249_s10 = smov [#allocation2]   ;;  %s179_s15 = scalar_lea.hbm %s340_s0, 128 }
   0x5   : > { %p269_p2 = pnand %p145_p0, %p60_p1  ;;  %s73_s11 = sshll.u32 %s249_s10, 4  ;;  %s74_s11 = int_to_ptr.vmem [resolvable:$true] %s73_s11 }
   0x6   : > { %s346_s9 = scalar_select %p275_p3, 1, 0 }
   0x7   : > { %s345_s8 = scalar_select %p269_p2, 1, 0 }
   0x8   : > { %p161_p4 = pneg %p269_p2  ;;  %p180_p6 = scmp.ne.s32.totalorder %s340_s0, %s179_s15 }
   0x9   : > { %p186_p10 = scmp.lt.u32.totalorder %s179_s15, %s340_s0 }
   0xa   : > { %p283_p5 = pnand %p275_p3, %p161_p4 }
   0xc   : > { %p181_p7 = pneg %p283_p5 }
   0xe   : > { %p182_p8 = pnand %p181_p7, %p180_p6 }
  0x10   : > { %p183_p9 = pneg %p182_p8 }
  0x12   : > { %p188_p11 = pnand %p186_p10, %p183_p9 }
  0x14   : > { %191 = shalt.err (!%p188_p11)
}
  0x15   : > { %s192_s20 = scalar_lea.vmem %s74_s11, 128  ;;  %p200_p1 = scmp.lt.s32.totalorder %s74_s11, %s74_s11 }
  0x16   : > { %p193_p12 = scmp.ne.s32.totalorder %s74_s11, %s192_s20  ;;  %p201_p4 = scmp.lt.s32.totalorder %s192_s20, %s192_s20 }
  0x18   : > { %p195_p13 = pnand %p193_p12, %p181_p7  ;;  %p202_p3 = por %p201_p4, %p200_p1 }
  0x1a   : > { %p196_p0 = pneg %p195_p13 }
  0x1c   : > { %p203_p2 = pnand %p202_p3, %p196_p0 }
  0x1e   : > { %206 = shalt.err (!%p203_p2)
}
  0x1f   : > { %164 = dma.hbm_to_vmem [thread:$0]  (!%p283_p5), %s340_s0, 128, %s74_s11, [#allocation3]  }
  0x20   : > { %p348_p6 = scmp.ne.s32.totalorder %s345_s8, 0 }
  0x21   : > { %p349_p8 = scmp.ne.s32.totalorder (!%p348_p6), %s346_s9, 0 }
  0x22   : > { %86 = sbr.rel (%p348_p6) target bundleno = 67 (0x43), region = 24 }
  0x29   : > { %238 = dma.done.wait (%p349_p8), [#allocation3], 128  }
  0x2a   : > { %240 = vsyncadd (%p349_p8), [#allocation3], 4294967168  ;;  %s250_s23 = smov [#allocation5]   ;;  %p311_p2 = scmp.eq.s32.totalorder %s144_s7, 1  ;;  %v96_v0 = vld [vmem:[#allocation2] sm:$0xff] }
  0x2b   : > { %s105_s24 = sshll.u32 %s250_s23, 4  ;;  %97 = vst [vmem:[#allocation5] sm:$0xff] %v96_v0  ;;  %s106_s24 = int_to_ptr.vmem [resolvable:$true] %s105_s24 }
  0x2c   : > { %s207_s26 = scalar_lea.vmem %s106_s24, 128  ;;  %p214_p9 = scmp.lt.s32.totalorder %s106_s24, %s106_s24 }
  0x2d   : > { %p208_p3 = scmp.ne.s32.totalorder %s106_s24, %s207_s26  ;;  %p215_p10 = scmp.lt.s32.totalorder %s207_s26, %s207_s26 }
  0x2f   : > { %p209_p5 = pnand %p208_p3, %p311_p2  ;;  %p216_p11 = por %p215_p10, %p214_p9 }
  0x31   : > { %p210_p7 = pneg %p209_p5 }
  0x33   : > { %p217_p12 = pnand %p216_p11, %p210_p7 }
  0x35   : > { %220 = shalt.err (!%p217_p12)
}
  0x36   : > { %s221_s29 = scalar_lea.hbm %s341_s1, 128 }
  0x37   : > { %p222_p13 = scmp.ne.s32.totalorder %s341_s1, %s221_s29  ;;  %p227_p4 = scmp.lt.u32.totalorder %s221_s29, %s341_s1 }
  0x39   : > { %p223_p0 = pnand %p222_p13, %p311_p2 }
  0x3b   : > { %p224_p1 = pneg %p223_p0 }
  0x3d   : > { %p229_p6 = pnand %p227_p4, %p224_p1 }
  0x3f   : > { %232 = shalt.err (!%p229_p6)
}
  0x40   : > { %158 = dma.vmem_to_hbm [thread:$0]  (%p311_p2), %s106_s24, 128, %s341_s1, [#allocation4]  }
  0x41   : > { %242 = dma.done.wait (%p311_p2), [#allocation4], 128  }
  0x42   : > { %244 = vsyncadd (%p311_p2), [#allocation4], 4294967168 }
  0x43 PF: > { %s13_s6 = sadd.s32 1, %s247_s6  }
  0x44   : > { %p10_p8 = scmp.ge.s32.totalorder %s13_s6, 4  }
  0x46   :  { %12 = sbr.rel (!%p10_p8) target bundleno = 2 (0x2), region = 53 }
  0x4d   :  { %118 = vsyncpa [#allocation3], 1 }
  0x4e   :  { %120 = vsyncpa [#allocation3 + $0x1], 1 }
  0x4f   :  { %121 = vsyncpa [#allocation4], 1 }
  0x50   :  { %123 = vsyncpa [#allocation4 + $0x1], 1 }

// kernel: tpu_custom_call.1
= control target key start
LH: loop header
LB: loop body
LE: loop exit
PB: predicated region body
PF: predicated region fallthrough
CT: control target
= control target key end

     0   :  { %s1793_s0 = inlined_call_operand.hbm [shape: f32[2,8,32], index: 0, kind: input, shape index: {}]   ;;  %s1794_s1 = inlined_call_operand.hbm [shape: f32[2,8,32], index: 1, kind: input, shape index: {}]   ;;  %s1795_s2 = inlined_call_operand.hbm [shape: f32[2,8,32], index: 2, kind: input, shape index: {}]   ;;  %s1796_s3 = inlined_call_operand.hbm [shape: bf16[32,96], index: 3, kind: input, shape index: {}]   ;;  %s1797_s4 = inlined_call_operand.vmem [shape: f32[1,96], index: 4, kind: input, shape index: {}]   ;;  %s1798_s5 = inlined_call_operand.hbm [shape: bf16[2,8,32], index: 5, kind: output, shape index: {0}]   ;;  %s1799_s6 = inlined_call_operand.hbm [shape: bf16[2,8,32], index: 6, kind: output, shape index: {1}]   ;;  %s1800_s7 = inlined_call_operand.hbm [shape: bf16[2,8,32], index: 7, kind: output, shape index: {2}]  }
   0x1   :  { %1823 = sst [smem:[#allocation26_spill]] %s1794_s1 }
   0x2   :  { %1824 = sst [smem:[#allocation27_spill]] %s1798_s5 }
   0x3   :  { %1825 = sst [smem:[#allocation28_spill]] %s1799_s6 }
   0x4   :  { %1826 = sst [smem:[#allocation29_spill]] %s1800_s7 }
   0x5   :  { %13 = vsyncpa [#allocation3], 0 }
   0x6   :  { %15 = vsyncpa [#allocation3 + $0x1], 0 }
   0x7   :  { %16 = vsyncpa [#allocation6], 0 }
   0x8   :  { %18 = vsyncpa [#allocation6 + $0x1], 0 }
   0x9   :  { %19 = vsyncpa [#allocation9], 0 }
   0xa   :  { %20 = vsyncpa [#allocation4], 0 }
   0xb   :  { %22 = vsyncpa [#allocation4 + $0x1], 0 }
   0xc   :  { %23 = vsyncpa [#allocation12], 0 }
   0xd   :  { %25 = vsyncpa [#allocation12 + $0x1], 0  ;;  %s1401_s24 = smov 0   ;;  %s1403_s25 = smov 0  }
   0xe   :  { %s1405_s26 = smov 0   ;;  %s1407_s27 = smov 0  }
   0xf   :  { %s1409_s28 = smov 0   ;;  %s1411_s29 = smov 0  }
  0x10 LB: > { %1827 = sst [smem:[#allocation19_spill]] %s1326_s24  ;;  %s43_s30 = sadd.s32 1, %s1342_s28  ;;  %s1346_s29 = sphi %s1411_s29, %s31_s29   ;;  %s1342_s28 = sphi %s1409_s28, %s1866_s28   ;;  %s1338_s27 = sphi %s1407_s27, %s1865_s27   ;;  %s1334_s26 = sphi %s1405_s26, %s1869_s26   ;;  %s1330_s25 = sphi %s1403_s25, %s1868_s25   ;;  %s1326_s24 = sphi %s1401_s24, %s1867_s24  }
  0x11   : > { %1828 = sst [smem:[#allocation20_spill]] %s1342_s28  ;;  %s52_s8 = sadd.s32 1, %s1334_s26 }
  0x12   : > { %1829 = sst [smem:[#allocation21_spill]] %s1346_s29  ;;  %p45_p0 = scmp.ge.s32.totalorder %s43_s30, 2 }
  0x13   : > { %p1801_p1 = scmp.ne.s32.totalorder %s1334_s26, %s1330_s25  ;;  %p60_p2 = scmp.eq.s32.totalorder %s1346_s29, 0 }
  0x14   : > { %s1871_s30 = smov (%p45_p0, %s43_s30), 0  ;;  %p1014_p5 = scmp.lt.s32.totalorder %s1346_s29, 2 }
  0x15   : > { %1830 = sst [smem:[#allocation22_spill]] %s1871_s30  ;;  %p61_p4 = por %p60_p2, %p1801_p1 }
  0x16   : > { %s47_s9 = ssub.s32 %s1342_s28, %s1871_s30  ;;  %s1803_s10 = sand.u32 1, %s1334_s26  }
  0x17   : > { %p50_p6 = scmp.eq.s32.totalorder %s47_s9, 0  ;;  %s1448_s11 = sshll.u32 %s1803_s10, 3 }
  0x18   : > { %s1451_s12 = sshll.u32 %s1342_s28, 7  ;;  %p1453_p7 = pnand %p1014_p5, %p61_p4 }
  0x19   : > { %s1458_s14 = scalar_select %p50_p6, %s1334_s26, %s52_s8  }
  0x1a   : > { %s1831_s13 = scalar_select %p1453_p7, 1, 0 }
  0x1b   : > { %1832 = sst [smem:[#allocation23_spill]] %s1458_s14  ;;  %s306_s15 = sand.u32 1, %s1346_s29  }
  0x1c   : > { %s1833_s1 = sld [smem:[#allocation26_spill]]  ;;  %s310_s19 = scalar_lea.vmem [#allocation5], %s1448_s11 }
  0x1d   : > { %s318_s20 = sshll.u32 %s310_s19, 4  ;;  %s1470_s21 = scalar_lea.sflag [#allocation6], %s306_s15  ;;  %s1468_s20 = int_to_ptr.vmem [resolvable:$true] %s318_s20 }
  0x1e   : > { %p1476_p9 = pneg %p1453_p7 }
  0x20   : > { %s1834_s23 = scalar_select %p1476_p9, 1, 0 }
  0x22   : > { %s1465_s18 = scalar_lea.hbm %s1833_s1, %s1451_s12  ;;  %s1083_s16 = scalar_lea.hbm %s1833_s1, 256 }
  0x23   : > { %s1078_s22 = scalar_lea.hbm %s1465_s18, 128  ;;  %p1084_p12 = scmp.lt.u32.totalorder %s1465_s18, %s1833_s1 }
  0x24   : > { %p1079_p8 = scmp.ne.s32.totalorder %s1465_s18, %s1078_s22  ;;  %p1085_p13 = scmp.lt.u32.totalorder %s1083_s16, %s1078_s22 }
  0x25   : > { %p1087_p2 = scmp.lt.u32.totalorder %s1078_s22, %s1465_s18 }
  0x26   : > { %p1081_p10 = pnand %p1476_p9, %p1079_p8  ;;  %p1086_p0 = por %p1085_p13, %p1084_p12 }
  0x28   : > { %p1082_p11 = pneg %p1081_p10  ;;  %p1088_p4 = por %p1087_p2, %p1086_p0 }
  0x2a   : > { %p1089_p5 = pnand %p1088_p4, %p1082_p11 }
  0x2c   : > { %1092 = shalt.err (!%p1089_p5)
}
  0x2d   : > { %s1093_s15 = scalar_lea.vmem %s1468_s20, 128  ;;  %s1348_s8 = smov [#allocation5]  }
  0x2e   : > { %p1094_p6 = scmp.ne.s32.totalorder %s1468_s20, %s1093_s15  ;;  %s1098_s9 = sshll.u32 %s1348_s8, 4  ;;  %s1099_s9 = int_to_ptr.vmem [resolvable:$false] %s1098_s9 }
  0x2f   : > { %s1100_s17 = scalar_lea.vmem %s1099_s9, 256  ;;  %p1101_p3 = scmp.lt.s32.totalorder %s1468_s20, %s1099_s9 }
  0x30   : > { %p1096_p8 = pnand %p1094_p6, %p1476_p9  ;;  %p1102_p1 = scmp.lt.s32.totalorder %s1100_s17, %s1093_s15 }
  0x32   : > { %p1097_p10 = pneg %p1096_p8  ;;  %p1103_p12 = por %p1102_p1, %p1101_p3 }
  0x34   : > { %p1104_p13 = pnand %p1103_p12, %p1097_p10 }
  0x36   : > { %1107 = shalt.err (!%p1104_p13)
}
  0x37   : > { %999 = dma.hbm_to_vmem [thread:$0]  (!%p1453_p7), %s1465_s18, 128, %s1468_s20, %s1470_s21  }
  0x38   : > { %s1501_s22 = sadd.s32 4294967295, %s1346_s29   ;;  %s1802_s16 = sadd.s32 4294967294, %s1346_s29  }
  0x39   : > { %p65_p1 = scmp.ne.s32.totalorder %s1330_s25, %s1326_s24  ;;  %p1810_p3 = scmp.eq.s32.totalorder %s1501_s22, 0 }
  0x3a   : > { %p189_p11 = scmp.eq.s32.totalorder %s1501_s22, 1  ;;  %p195_p0 = scmp.eq.s32.totalorder %s1802_s16, 1 }
  0x3b   : > { %p903_p2 = scmp.ge.s32.totalorder %s1346_s29, 1  ;;  %p1513_p4 = por %p1810_p3, %p65_p1 }
  0x3c   : > { %p1836_p5 = scmp.ne.s32.totalorder %s1334_s26, %s1330_s25  ;;  %p1524_p8 = por %p195_p0, %p65_p1 }
  0x3d   : > { %s1835_s19 = scalar_select %p1513_p4, 1, 0 }
  0x3e   : > { %p1520_p6 = por %p189_p11, %p1836_p5  ;;  %p258_p10 = scmp.lt.s32.totalorder %s1346_s29, 3 }
  0x3f   : > { %s1839_s20 = scalar_select %p1524_p8, 1, 0 }
  0x40   : > { %s1837_s18 = scalar_select %p1520_p6, 1, 0 }
  0x41   : > { %1840 = sst [smem:[#allocation25_spill]] %s1839_s20  ;;  %p1529_p12 = pnand %p903_p2, %p258_p10 }
  0x42   : > { %1838 = sst [smem:[#allocation24_spill]] %s1837_s18  ;;  %s1349_s8 = smov [#allocation8]  }
  0x43   : > { %s1841_s15 = scalar_select %p1529_p12, 1, 0 }
  0x44   : > { %s270_s9 = sshll.u32 %s1349_s8, 4  ;;  %p989_p13 = pneg %p1529_p12  ;;  %s1533_s9 = int_to_ptr.vmem [resolvable:$true] %s270_s9 }
  0x45   : > { %s1547_s1 = scalar_lea.hbm %s1793_s0, %s1451_s12  ;;  %s291_s30 = scalar_lea.vmem [#allocation2], %s1448_s11 }
  0x46   : > { %p1539_p11 = pnand %p989_p13, %p1810_p3  ;;  %s299_s28 = sshll.u32 %s291_s30, 4  ;;  %s1550_s28 = int_to_ptr.vmem [resolvable:$true] %s299_s28 }
  0x47   : > { %s1108_s29 = scalar_lea.hbm %s1796_s3, 256 }
  0x48   : > { %p1109_p1 = scmp.ne.s32.totalorder %s1796_s3, %s1108_s29  ;;  %p1110_p0 = pneg %p1539_p11 }
  0x49   : > { %p1115_p10 = scmp.lt.u32.totalorder %s1108_s29, %s1796_s3 }
  0x4a   : > { %p1111_p2 = pnand %p1110_p0, %p1109_p1 }
  0x4c   : > { %p1112_p5 = pneg %p1111_p2 }
  0x4e   : > { %p1117_p13 = pnand %p1115_p10, %p1112_p5 }
  0x50   : > { %1120 = shalt.err (!%p1117_p13)
}
  0x51   : > { %s1121_s30 = scalar_lea.vmem %s1533_s9, 256  ;;  %p1129_p4 = scmp.lt.s32.totalorder %s1533_s9, %s1533_s9 }
  0x52   : > { %p1122_p3 = scmp.ne.s32.totalorder %s1533_s9, %s1121_s30  ;;  %p1130_p12 = scmp.lt.s32.totalorder %s1121_s30, %s1121_s30 }
  0x54   : > { %p1124_p8 = pnand %p1122_p3, %p1110_p0  ;;  %p1131_p7 = por %p1130_p12, %p1129_p4 }
  0x56   : > { %p1125_p6 = pneg %p1124_p8 }
  0x58   : > { %p1132_p9 = pnand %p1131_p7, %p1125_p6 }
  0x5a   : > { %1135 = shalt.err (!%p1132_p9)
}
  0x5b   : > { %s1350_s24 = smov 64   ;;  %s1351_s29 = smov 4  }
  0x5c   : > { %992 = dma.hbm_to_vmem [thread:$0]  (!%p1539_p11), %s1796_s3, 256, %s1533_s9, [#allocation9], %s1350_s24, %s1350_s24, %s1351_s29  }
  0x5d   : > { %s1843_s8 = sand.u32 1, %s1334_s26   ;;  %s1136_s16 = scalar_lea.hbm %s1547_s1, 128 }
  0x5e   : > { %s288_s10 = scalar_lea.sflag [#allocation3], %s1843_s8  ;;  %p1137_p7 = scmp.ne.s32.totalorder %s1547_s1, %s1136_s16 }
  0x5f   : > { %p1844_p9 = scmp.ne.s32.totalorder %s1834_s23, 0  ;;  %s1141_s6 = scalar_lea.hbm %s1793_s0, 256 }
  0x60   : > { %p1142_p6 = scmp.lt.u32.totalorder %s1547_s1, %s1793_s0  ;;  %p1143_p8 = scmp.lt.u32.totalorder %s1141_s6, %s1136_s16 }
  0x61   : > { %p1139_p3 = pnand %p1137_p7, %p1844_p9  ;;  %p1145_p1 = scmp.lt.u32.totalorder %s1136_s16, %s1547_s1 }
  0x62   : > { %p1144_p12 = por %p1143_p8, %p1142_p6 }
  0x63   : > { %p1140_p4 = pneg %p1139_p3 }
  0x64   : > { %p1146_p0 = por %p1145_p1, %p1144_p12 }
  0x66   : > { %p1147_p11 = pnand %p1146_p0, %p1140_p4 }
  0x68   : > { %1150 = shalt.err (!%p1147_p11)
}
  0x69   : > { %s1151_s9 = scalar_lea.vmem %s1550_s28, 128  ;;  %s1352_s7 = smov [#allocation2]  }
  0x6a   : > { %p1152_p2 = scmp.ne.s32.totalorder %s1550_s28, %s1151_s9  ;;  %s1156_s17 = sshll.u32 %s1352_s7, 4  ;;  %s1157_s17 = int_to_ptr.vmem [resolvable:$false] %s1156_s17 }
  0x6b   : > { %s1158_s5 = scalar_lea.vmem %s1157_s17, 256  ;;  %p1159_p13 = scmp.lt.s32.totalorder %s1550_s28, %s1157_s17 }
  0x6c   : > { %p1154_p5 = pnand %p1152_p2, %p1844_p9  ;;  %p1160_p7 = scmp.lt.s32.totalorder %s1158_s5, %s1151_s9 }
  0x6e   : > { %p1155_p10 = pneg %p1154_p5  ;;  %p1161_p3 = por %p1160_p7, %p1159_p13 }
  0x70   : > { %p1162_p6 = pnand %p1161_p3, %p1155_p10 }
  0x72   : > { %1165 = shalt.err (!%p1162_p6)
}
  0x73   : > { %p1845_p4 = scmp.ne.s32.totalorder %s1831_s13, 0  ;;  %s1600_s24 = scalar_lea.hbm %s1795_s2, %s1451_s12 }
  0x74   : > { %s329_s29 = scalar_lea.vmem [#allocation7], %s1448_s11  ;;  %s1166_s20 = scalar_lea.hbm %s1600_s24, 128 }
  0x75   : > { %996 = dma.hbm_to_vmem [thread:$0]  (!%p1845_p4), %s1547_s1, 128, %s1550_s28, %s288_s10  }
  0x76   : > { %s337_s14 = sshll.u32 %s329_s29, 4  ;;  %p1167_p8 = scmp.ne.s32.totalorder %s1600_s24, %s1166_s20  ;;  %s338_s14 = int_to_ptr.vmem [resolvable:$true] %s337_s14 }
  0x77   : > { %s1171_s1 = scalar_lea.hbm %s1795_s2, 256  ;;  %p1172_p0 = scmp.lt.u32.totalorder %s1600_s24, %s1795_s2 }
  0x78   : > { %p1169_p12 = pnand %p1167_p8, %p1844_p9  ;;  %p1173_p11 = scmp.lt.u32.totalorder %s1171_s1, %s1166_s20 }
  0x79   : > { %p1175_p5 = scmp.lt.u32.totalorder %s1166_s20, %s1600_s24 }
  0x7a   : > { %p1170_p1 = pneg %p1169_p12  ;;  %p1174_p2 = por %p1173_p11, %p1172_p0 }
  0x7c   : > { %p1176_p10 = por %p1175_p5, %p1174_p2 }
  0x7e   : > { %p1177_p13 = pnand %p1176_p10, %p1170_p1 }
  0x80   : > { %1180 = shalt.err (!%p1177_p13)
}
  0x81   : > { %s1181_s11 = scalar_lea.vmem %s338_s14, 128  ;;  %s1353_s12 = smov [#allocation7]  }
  0x82   : > { %p1182_p7 = scmp.ne.s32.totalorder %s338_s14, %s1181_s11  ;;  %s1186_s30 = sshll.u32 %s1353_s12, 4  ;;  %s1187_s30 = int_to_ptr.vmem [resolvable:$false] %s1186_s30 }
  0x83   : > { %s1188_s9 = scalar_lea.vmem %s1187_s30, 256  ;;  %p1189_p8 = scmp.lt.s32.totalorder %s338_s14, %s1187_s30 }
  0x84   : > { %p1184_p3 = pnand %p1182_p7, %p1844_p9  ;;  %p1190_p12 = scmp.lt.s32.totalorder %s1188_s9, %s1181_s11 }
  0x86   : > { %p1185_p6 = pneg %p1184_p3  ;;  %p1191_p4 = por %p1190_p12, %p1189_p8 }
  0x88   : > { %p1192_p0 = pnand %p1191_p4, %p1185_p6 }
  0x8a   : > { %1195 = shalt.err (!%p1192_p0)
}
  0x8b   : > { %p1846_p11 = scmp.ne.s32.totalorder %s1831_s13, 0  ;;  %p1847_p1 = scmp.ne.s32.totalorder %s1841_s15, 0 }
  0x8c   : > { %s1624_s23 = sand.u32 (!%p1847_p1), 1, %s1330_s25   ;;  %p1848_p9 = scmp.ne.s32.totalorder (!%p1847_p1), %s1835_s19, 0 }
  0x8d   : > { %1002 = dma.hbm_to_vmem [thread:$0]  (!%p1846_p11), %s1600_s24, 128, %s338_s14, %s1470_s21  }
  0x8e   : > { %346 = sbr.rel (%p1847_p1) target bundleno = 536 (0x218), region = 40  ;;  %s1627_s7 = sshll.u32 (!%p1847_p1), %s1624_s23, 3 }
  0x8f   : > { %s349_s17 = scalar_lea.sflag (!%p1847_p1), [#allocation3], %s1624_s23  ;;  %s352_s5 = scalar_lea.vmem (!%p1847_p1), [#allocation2], %s1627_s7 }
  0x95   : > { %1305 = dma.done.wait (%p1848_p9), %s349_s17, 128  }
  0x96   : > { %1307 = vsyncadd (%p1848_p9), %s349_s17, 4294967168  ;;  %s357_s13 = sand.u32 1, %s1501_s22   ;;  %s361_s15 = scalar_lea.vmem [#allocation5], %s1627_s7 }
  0x97   : > { %s358_s21 = scalar_lea.sflag [#allocation6], %s357_s13 }
  0x98   : > { %1309 = dma.done.wait (%p1848_p9), %s358_s21, 256  }
  0x99   : > { %1311 = vsyncadd (%p1848_p9), %s358_s21, 4294967040  ;;  %s370_s6 = scalar_lea.vmem [#allocation7], %s1627_s7  ;;  %p1849_p4 = scmp.eq.s32.totalorder %s1501_s22, 0 }
  0x9b   : > { %1313 = dma.done.wait (%p1849_p4), [#allocation9], 256   ;;  %p1850_p2 = pmov %p1849_p4 }
  0x9c   : > { %v1354_v0 = vmov 0.0   ;;  %vm1355_vm0 = vmmov 0   ;;  %v1072_v1 = vld [vmem:[#allocation8] sm:$0xff]   ;;  %v1073_v2 = vld [vmem:[#allocation8 + $0x8] sm:$0xff]   ;;  %s1356_s19 = smov 96   ;;  %s1357_s18 = smov 64  }
  0x9d   : > { %1315 = vsyncadd (%p1850_p2), [#allocation9], 4294967040  ;;  %949 = vmatprep.subr.bf16.mxu0 %v1354_v0  ;;  %957 = vmatprep.subr.bf16.mxu1 %v1354_v0  ;;  %v1074_v3 = vld [vmem:[#allocation8] sm:$0xff]   ;;  %v1075_v4 = vld [vmem:[#allocation8 + $0x8] sm:$0xff]   ;;  %vm451_vm1 = vcmask 261120   ;;  %s1662_s14 = sshll.u32 %s1624_s23, 2 }
  0x9e   : > { %953 = vmatprep.mubr.msk.bf16.mxu0 %vm1355_vm0, %v1354_v0  ;;  %961 = vmatprep.mubr.msk.bf16.mxu1 %vm1355_vm0, %v1354_v0  ;;  %v1076_v5 = vld [vmem:[#allocation8] sm:$0xff]   ;;  %v1077_v6 = vld [vmem:[#allocation8 + $0x8] sm:$0xff]   ;;  %v426_v7 = vld [vmem:[%s352_s5] sm:$0xff]  ;;  %s1851_s20 = sld [smem:[#allocation24_spill]]  ;;  %s1665_s8 = sshll.u32 %s1338_s27, 6  ;;  %vm496_vm2 = vcmask 257024  }
  0x9f   : > { %520 = vrot.lane.b32.xlu0 %v1072_v1, %s1356_s19  ;;  %522 = vrot.lane.b32.xlu1 %v1073_v2, %s1356_s19  ;;  %v924_v8 = vld [vmem:[%s1797_s4] ss:$0 sm:$0xff]  ;;  %v427_v9 = vpack.c.bf16 %v426_v7, %v426_v7  ;;  %v498_v12 = vld [vmem:[%s361_s15] sm:$0xff]  ;;  %s410_s16 = scalar_lea.vmem [#allocation10], %s1662_s14  ;;  %s1852_s11 = sld [smem:[#allocation27_spill]] }
  0xa0   : > { %950 = vmatpush3.bf16.msra.mxu0 %v1076_v5  ;;  %v499_v14 = vpack.c.bf16 %v498_v12, %v498_v12  ;;  %v574_v15 = vld [vmem:[%s370_s6] sm:$0xff]  ;;  %s675_s1 = sshll.u32 %s410_s16, 4  ;;  %s651_s27 = scalar_lea.sflag [#allocation4], %s1624_s23  ;;  %s1674_s1 = int_to_ptr.vmem [resolvable:$true] %s675_s1 }
  0xa1   : > { %951 = vmatprep.subr.bf16.mxu0 %v1354_v0  ;;  %v575_v17 = vpack.c.bf16 %v574_v15, %v574_v15  ;;  %s1196_s30 = scalar_lea.vmem %s1674_s1, 64  ;;  %s1358_s9 = smov [#allocation10]  }
  0xa2   : > { %p1197_p5 = scmp.ne.s32.totalorder %s1674_s1, %s1196_s30  ;;  %s1200_s7 = sshll.u32 %s1358_s9, 4  ;;  %s1201_s7 = int_to_ptr.vmem [resolvable:$false] %s1200_s7 }
  0xa3   : > { %596 = vrot.lane.b32.xlu0 %v1074_v3, %s1357_s18  ;;  %598 = vrot.lane.b32.xlu1 %v1075_v4, %s1357_s18  ;;  %s1202_s17 = scalar_lea.vmem %s1201_s7, 128  ;;  %p1203_p3 = scmp.lt.s32.totalorder %s1674_s1, %s1201_s7 }
  0xa4   : > { %952 = vmatpush3.bf16.msra.mxu0 %v1077_v6  ;;  %p1853_p10 = scmp.ne.s32.totalorder %s1851_s20, 0  ;;  %p1204_p6 = scmp.lt.s32.totalorder %s1202_s17, %s1196_s30 }
  0xa5   : > { %965 = vmatprep.subr.bf16.mxu0 %v1354_v0  ;;  %s1672_s12 = scalar_lea.hbm %s1852_s11, %s1665_s8 }
  0xa6   : > { %p1198_p13 = pnand %p1197_p5, %p1853_p10  ;;  %p1205_p8 = por %p1204_p6, %p1203_p3 }
  0xa7   : > { %526 = vrot.lane.b32.xlu0 %v924_v8, %s1356_s19  ;;  %602 = vrot.lane.b32.xlu1 %v924_v8, %s1357_s18 }
  0xa8   : > { %954 = vmatmul.mubr.msk.bf16.vlgmr.msra.gmra.mrb[0].mxu0 %vm451_vm1, %v427_v9  ;;  %p1199_p7 = pneg %p1198_p13 }
  0xa9   : > { %969 = vmatprep.mubr.msk.bf16.mxu0 %vm1355_vm0, %v1354_v0 }
  0xaa   : > { %p1206_p12 = pnand %p1205_p8, %p1199_p7 }
 0x111   : > { %v521_v10 = vpop.permute.xlu0 %520  ;;  %v523_v11 = vpop.permute.xlu1 %522 }
 0x112   : > { %958 = vmatpush3.bf16.msra.mxu1 %v521_v10 }
 0x113   : > { %959 = vmatprep.subr.bf16.mxu1 %v1354_v0 }
 0x115   : > { %v597_v13 = vpop.permute.xlu0 %596  ;;  %v599_v16 = vpop.permute.xlu1 %598 }
 0x116   : > { %960 = vmatpush3.bf16.msra.mxu1 %v523_v11  ;;  %966 = vmatpush3.bf16.msra.mxu0 %v597_v13 }
 0x117   : > { %967 = vmatprep.subr.bf16.mxu0 %v1354_v0 }
 0x119   : > { %962 = vmatmul.mubr.msk.bf16.vlgmr.msra.gmra.mrb[0].mxu1 %vm451_vm1, %v499_v14 }
 0x11a   : > { %968 = vmatpush3.bf16.msra.mxu0 %v599_v16 }
 0x11d   : > { %970 = vmatmul.mubr.msk.bf16.vlgmr.msra.gmra.mrb[4].mxu0 %vm451_vm1, %v575_v17 }
 0x17b   : > { %v489_v18 = vpop.f32.mrb[0].mxu0 }
 0x17c   : > { %v490_v19 = vadd.f32 %v924_v8, %v489_v18  ;;  %v955_v20 = vpop.f32.mrb[1].mxu0 }
 0x17d   : > { %v492_v21 = vpop.f32.mrb[2].mxu0 }
 0x17e   : > { %v495_v22 = vpack.c.bf16 %v490_v19, %v490_v19  ;;  %v956_v23 = vpop.f32.mrb[3].mxu0 }
 0x180   : > { %497 = vst.msk [vmem:[%s410_s16] sm:$0xf] %vm496_vm2, %v495_v22 }
 0x181   : > { %1209 = shalt.err (!%p1206_p12)
}
 0x182   : > { %s1210_s23 = scalar_lea.hbm %s1672_s12, 64  ;;  %s1214_s15 = scalar_lea.hbm %s1852_s11, 128 }
 0x183   : > { %p1211_p0 = scmp.ne.s32.totalorder %s1672_s12, %s1210_s23  ;;  %p1215_p9 = scmp.lt.u32.totalorder %s1672_s12, %s1852_s11 }
 0x184   : > { %p1216_p4 = scmp.lt.u32.totalorder %s1214_s15, %s1210_s23  ;;  %p1218_p5 = scmp.lt.u32.totalorder %s1210_s23, %s1672_s12 }
 0x185   : > { %p1212_p11 = pnand %p1211_p0, %p1853_p10 }
 0x186   : > { %p1217_p2 = por %p1216_p4, %p1215_p9 }
 0x187   : > { %p1213_p1 = pneg %p1212_p11 }
 0x188   : > { %p1219_p13 = por %p1218_p5, %p1217_p2 }
 0x18a   : > { %p1220_p7 = pnand %p1219_p13, %p1213_p1 }
 0x18c   : > { %1223 = shalt.err (!%p1220_p7)
}
 0x18d   : > { %983 = dma.vmem_to_hbm [thread:$0]  (%p1853_p10), %s1674_s1, 64, %s1672_s12, %s651_s27   ;;  %v527_v24 = vpop.permute.xlu0 %526  ;;  %v603_v29 = vpop.permute.xlu1 %602 }
 0x18e   : > { %s417_s18 = scalar_lea.vmem [#allocation11], %s1662_s14  ;;  %s1854_s28 = sld [smem:[#allocation28_spill]] }
 0x18f   : > { %s689_s24 = sshll.u32 %s417_s18, 4  ;;  %s424_s1 = scalar_lea.vmem [#allocation13], %s1662_s14  ;;  %s1706_s24 = int_to_ptr.vmem [resolvable:$true] %s689_s24 }
 0x190   : > { %s1711_s12 = sshll.u32 %s424_s1, 4  ;;  %s1716_s27 = scalar_lea.sflag [#allocation12], %s357_s13  ;;  %s704_s12 = int_to_ptr.vmem [resolvable:$true] %s1711_s12 }
 0x191   : > { %s1224_s9 = scalar_lea.vmem %s1706_s24, 64  ;;  %s1359_s7 = smov [#allocation11]  }
 0x192   : > { %p1225_p3 = scmp.ne.s32.totalorder %s1706_s24, %s1224_s9  ;;  %s1228_s17 = sshll.u32 %s1359_s7, 4  ;;  %s1229_s17 = int_to_ptr.vmem [resolvable:$false] %s1228_s17 }
 0x193   : > { %s1230_s23 = scalar_lea.vmem %s1229_s17, 128  ;;  %p1231_p12 = scmp.lt.s32.totalorder %s1706_s24, %s1229_s17 }
 0x194   : > { %s1855_s10 = smov %s1854_s28  ;;  %s1704_s30 = scalar_lea.hbm %s1854_s28, %s1665_s8 }
 0x195   : > { %p1226_p6 = pnand %p1225_p3, %p1853_p10  ;;  %p1232_p0 = scmp.lt.s32.totalorder %s1230_s23, %s1224_s9 }
 0x197   : > { %p1227_p8 = pneg %p1226_p6  ;;  %p1233_p11 = por %p1232_p0, %p1231_p12 }
 0x199   : > { %p1234_p1 = pnand %p1233_p11, %p1227_p8 }
 0x1ec   : > { %v566_v25 = vpop.f32.mrb[0].mxu1 }
 0x1ed   : > { %v963_v26 = vpop.f32.mrb[1].mxu1  ;;  %v567_v27 = vadd.f32 %v566_v25, %v527_v24 }
 0x1ee   : > { %v569_v28 = vpop.f32.mrb[2].mxu1 }
 0x1ef   : > { %v572_v30 = vpack.c.bf16 %v567_v27, %v567_v27  ;;  %v964_v31 = vpop.f32.mrb[3].mxu1 }
 0x1f0   : > { %v642_v32 = vpop.f32.mrb[4].mxu0 }
 0x1f1   : > { %v643_v33 = vadd.f32 %v642_v32, %v603_v29  ;;  %v971_v34 = vpop.f32.mrb[5].mxu0  ;;  %573 = vst.msk [vmem:[%s417_s18] sm:$0xf] %vm496_vm2, %v572_v30 }
 0x1f2   : > { %v645_v35 = vpop.f32.mrb[6].mxu0 }
 0x1f3   : > { %1237 = shalt.err (!%p1234_p1)
}
 0x1f4   : > { %s1238_s22 = scalar_lea.hbm %s1704_s30, 64  ;;  %s1242_s21 = scalar_lea.hbm %s1855_s10, 128 }
 0x1f5   : > { %p1239_p9 = scmp.ne.s32.totalorder %s1704_s30, %s1238_s22  ;;  %p1243_p5 = scmp.lt.u32.totalorder %s1704_s30, %s1855_s10 }
 0x1f6   : > { %p1244_p13 = scmp.lt.u32.totalorder %s1242_s21, %s1238_s22  ;;  %p1246_p3 = scmp.lt.u32.totalorder %s1238_s22, %s1704_s30 }
 0x1f7   : > { %p1240_p4 = pnand %p1239_p9, %p1853_p10 }
 0x1f8   : > { %p1245_p7 = por %p1244_p13, %p1243_p5 }
 0x1f9   : > { %p1241_p2 = pneg %p1240_p4 }
 0x1fa   : > { %p1247_p6 = por %p1246_p3, %p1245_p7 }
 0x1fc   : > { %p1248_p8 = pnand %p1247_p6, %p1241_p2 }
 0x1fe   : > { %1251 = shalt.err (!%p1248_p8)
}
 0x1ff   : > { %984 = dma.vmem_to_hbm [thread:$0]  (%p1853_p10), %s1706_s24, 64, %s1704_s30, %s1716_s27   ;;  %v648_v36 = vpack.c.bf16 %v643_v33, %v643_v33  ;;  %v972_v37 = vpop.f32.mrb[7].mxu0 }
 0x200   : > { %s1856_s29 = sld [smem:[#allocation29_spill]]  ;;  %s1252_s9 = scalar_lea.vmem %s704_s12, 64 }
 0x201   : > { %649 = vst.msk [vmem:[%s424_s1] sm:$0xf] %vm496_vm2, %v648_v36  ;;  %p1253_p12 = scmp.ne.s32.totalorder %s704_s12, %s1252_s9  ;;  %s1360_s7 = smov [#allocation13]  }
 0x202   : > { %s1256_s17 = sshll.u32 %s1360_s7, 4  ;;  %s1257_s17 = int_to_ptr.vmem [resolvable:$false] %s1256_s17 }
 0x203   : > { %p1254_p0 = pnand %p1253_p12, %p1853_p10  ;;  %s1258_s24 = scalar_lea.vmem %s1257_s17, 128 }
 0x204   : > { %p1259_p1 = scmp.lt.s32.totalorder %s704_s12, %s1257_s17  ;;  %p1260_p9 = scmp.lt.s32.totalorder %s1258_s24, %s1252_s9 }
 0x205   : > { %p1255_p11 = pneg %p1254_p0 }
 0x206   : > { %s1857_s16 = smov %s1856_s29  ;;  %s1744_s28 = scalar_lea.hbm %s1856_s29, %s1665_s8 }
 0x207   : > { %p1261_p4 = por %p1260_p9, %p1259_p1 }
 0x209   : > { %p1262_p2 = pnand %p1261_p4, %p1255_p11 }
 0x20b   : > { %1265 = shalt.err (!%p1262_p2)
}
 0x20c   : > { %s1266_s14 = scalar_lea.hbm %s1744_s28, 64  ;;  %s1270_s1 = scalar_lea.hbm %s1857_s16, 128 }
 0x20d   : > { %p1267_p5 = scmp.ne.s32.totalorder %s1744_s28, %s1266_s14  ;;  %p1271_p3 = scmp.lt.u32.totalorder %s1744_s28, %s1857_s16 }
 0x20e   : > { %p1272_p6 = scmp.lt.u32.totalorder %s1270_s1, %s1266_s14  ;;  %p1274_p12 = scmp.lt.u32.totalorder %s1266_s14, %s1744_s28 }
 0x20f   : > { %p1268_p13 = pnand %p1267_p5, %p1853_p10 }
 0x210   : > { %p1273_p8 = por %p1272_p6, %p1271_p3 }
 0x211   : > { %p1269_p7 = pneg %p1268_p13 }
 0x212   : > { %p1275_p0 = por %p1274_p12, %p1273_p8 }
 0x214   : > { %p1276_p11 = pnand %p1275_p0, %p1269_p7 }
 0x216   : > { %1279 = shalt.err (!%p1276_p11)
}
 0x217   : > { %985 = dma.vmem_to_hbm [thread:$0]  (%p1853_p10), %s704_s12, 64, %s1744_s28, %s1716_s27  }
 0x218 PF: > { %s1858_s13 = sld [smem:[#allocation19_spill]]  ;;  %s1859_s5 = sld [smem:[#allocation25_spill]] }
 0x219   : > { %s1860_s21 = sld [smem:[#allocation21_spill]] }
 0x21e   : > { %s715_s15 = sand.u32 1, %s1858_s13   ;;  %p1861_p1 = scmp.ne.s32.totalorder %s1859_s5, 0 }
 0x21f   : > { %p1862_p9 = scmp.ge.s32.totalorder %s1860_s21, 2  ;;  %s716_s6 = scalar_lea.sflag [#allocation4], %s715_s15 }
 0x221   : > { %p1004_p4 = pnand %p1862_p9, %p1861_p1 }
 0x223   : > { %1317 = dma.done.wait (!%p1004_p4), %s716_s6, 64  }
 0x224   : > { %1319 = vsyncadd (!%p1004_p4), %s716_s6, 4294967232  ;;  %s1863_s19 = sadd.s32 4294967294, %s1860_s21  }
 0x225   : > { %s724_s18 = sand.u32 1, %s1863_s19  }
 0x226   : > { %s725_s29 = scalar_lea.sflag [#allocation12], %s724_s18 }
 0x227   : > { %1321 = dma.done.wait (!%p1004_p4), %s725_s29, 128  }
 0x228   : > { %1323 = vsyncadd (!%p1004_p4), %s725_s29, 4294967168  ;;  %s31_s29 = sadd.s32 1, %s1860_s21   ;;  %s1864_s20 = sld [smem:[#allocation23_spill]] }
 0x229   : > { %p28_p10 = scmp.ge.s32.totalorder %s31_s29, 4   ;;  %s1865_s27 = sld [smem:[#allocation20_spill]] }
 0x22a   : > { %s1866_s28 = sld [smem:[#allocation22_spill]]  ;;  %s1867_s24 = smov %s1330_s25 }
 0x22b   : > { %s1868_s25 = smov %s1334_s26  ;;  %30 = sbr.rel (!%p28_p10) target bundleno = 16 (0x10), region = 145 }
 0x22e   : > { %s1869_s26 = smov %s1864_s20 }
 0x232   :  { %739 = vsyncpa [#allocation3], 1 }
 0x233   :  { %741 = vsyncpa [#allocation3 + $0x1], 1 }
 0x234   :  { %742 = vsyncpa [#allocation6], 1 }
 0x235   :  { %744 = vsyncpa [#allocation6 + $0x1], 1 }
 0x236   :  { %745 = vsyncpa [#allocation9], 1 }
 0x237   :  { %746 = vsyncpa [#allocation4], 1 }
 0x238   :  { %748 = vsyncpa [#allocation4 + $0x1], 1 }
 0x239   :  { %749 = vsyncpa [#allocation12], 1 }
 0x23a   :  { %751 = vsyncpa [#allocation12 + $0x1], 1 }

</bundles_post_ra>
